<compile_context>
chip_gen: v6e
topology: v6e:2x2x1
jax: 0.10.0
libtpu: 0.0.40
codegen_flags: <defaults>
</compile_context>

<pallas_src>
import functools

import jax
import jax.numpy as jnp
from jax.experimental import pallas as pl
from jax.experimental.pallas import tpu as pltpu

_LANE = 1024                          # lane-dense last dim for the "nice" view
_TARGET_BUFFER_BYTES = 4 * 1024 * 1024   # ~4 MiB lane-padded VMEM per buffer
_VMEM_LIMIT_BYTES = 32 * 1024 * 1024     # safe on v5e/v6e (128 MiB) and v7x (64 MiB)


def _sublane_for(dtype) -> int:
    itemsize = jnp.dtype(dtype).itemsize
    return {4: 8, 2: 16, 1: 32}.get(itemsize, 8)


def _scale_kernel(x_ref, o_ref, *, scale):
    # Multiply in the input dtype (weakly-typed python float scale), matching
    # torch's tensor * python-scalar semantics for f32/bf16/f16 inputs.
    o_ref[...] = x_ref[...] * scale


def uniform_box_warp(coordinates: jax.Array, sidelength: float, *, donate: bool = False) -> jax.Array:
    """Pallas equivalent of UniformBoxWarp(sidelength).forward(coordinates)."""
    scale = 2.0 / float(sidelength)           # compile-time constant
    orig_shape = coordinates.shape
    dtype = coordinates.dtype
    itemsize = jnp.dtype(dtype).itemsize
    sub = _sublane_for(dtype)
    total = int(coordinates.size)

    # ---- 2-D view of the contiguous buffer (bitcast, no HBM copy) ----------
    if total % _LANE == 0:
        R, C = total // _LANE, _LANE                    # fully lane-dense slab
    elif coordinates.ndim >= 2 and orig_shape[0] > 0:
        R, C = orig_shape[0], total // orig_shape[0]    # e.g. (B, N*3)
    else:
        R, C = 1, total
    x2d = coordinates.reshape(R, C)

    # ---- block sizing: ~_TARGET_BUFFER_BYTES of lane-padded VMEM per buffer -
    target_elems = max(_TARGET_BUFFER_BYTES // itemsize, 128 * sub)
    padded_c = pl.cdiv(C, 128) * 128
    max_bc = max((target_elems // sub // 128) * 128, 128)
    if padded_c <= max_bc:
        bc, padded_bc = C, padded_c           # full width -> contiguous DMAs
    else:
        bc = padded_bc = max_bc               # lane-aligned column block (mult of 128)
    rows_fit = max(target_elems // padded_bc, sub)
    if R <= sub:
        br = R                                # full (tiny) row extent
    else:
        br = max((min(R, rows_fit) // sub) * sub, sub)

    gr, gc = pl.cdiv(R, br), pl.cdiv(C, bc)
    # v7x megacore: make sure the 'parallel' grid has >=2 steps when possible.
    if gr * gc == 1:
        if R > sub:
            br = ((pl.cdiv(R, 2) + sub - 1) // sub) * sub
        elif C > 2 * 128:
            bc = pl.cdiv(pl.cdiv(C, 2), 128) * 128
        gr, gc = pl.cdiv(R, br), pl.cdiv(C, bc)

    out2d = pl.pallas_call(
        functools.partial(_scale_kernel, scale=scale),
        out_shape=jax.ShapeDtypeStruct((R, C), dtype),
        grid=(gr, gc),
        in_specs=[pl.BlockSpec((br, bc), lambda i, j: (i, j))],
        out_specs=pl.BlockSpec((br, bc), lambda i, j: (i, j)),
        input_output_aliases=({0: 0} if donate else {}),
        compiler_params=pltpu.CompilerParams(
            dimension_semantics=("parallel", "parallel"),
            vmem_limit_bytes=_VMEM_LIMIT_BYTES,
        ),
    )(x2d)

    # Pure bitcast back to the original shape — no extra HBM pass.
    return out2d.reshape(orig_shape)


if __name__ == "__main__":
    key = jax.random.PRNGKey(0)
    sidelength = 0.24                    # typical pi-GAN config value
    ref_scale = 2.0 / sidelength

    # Case 1: module-shaped input (batch=2, 8 points, xyz) -> (B, N*3) view.
    coords = jax.random.normal(key, (2, 8, 3), dtype=jnp.float32)
    out = jax.block_until_ready(uniform_box_warp(coords, sidelength))
    ref = coords * ref_scale
    assert out.shape == coords.shape and out.dtype == coords.dtype
    assert jnp.allclose(out, ref, rtol=1e-6, atol=1e-6)

    # Case 2: lane-dense path (total % 1024 == 0) with a split/ragged grid.
    coords2 = jax.random.normal(jax.random.PRNGKey(1), (4, 256, 3), dtype=jnp.float32)
    out2 = jax.block_until_ready(uniform_box_warp(coords2, sidelength))
    ref2 = coords2 * ref_scale
    assert jnp.allclose(out2, ref2, rtol=1e-6, atol=1e-6)

    # Case 3: bf16 input — in-dtype multiply, dtype-aware sublane handling.
    coords3 = jax.random.normal(key, (2, 8, 3), dtype=jnp.bfloat16)
    out3 = jax.block_until_ready(uniform_box_warp(coords3, sidelength))
    ref3 = coords3 * ref_scale
    assert out3.dtype == jnp.bfloat16
    assert jnp.allclose(out3.astype(jnp.float32), ref3.astype(jnp.float32),
                        rtol=2e-2, atol=2e-2)

    print("KERNEL_OK")
</pallas_src>

<mosaic_0001>
module attributes {stable_mosaic.version = 11 : i64} {
  func.func @_scale_kernel(%arg0: i32, %arg1: i32, %arg2: memref<2x24xf32, #tpu.memory_space<vmem>>, %arg3: memref<2x24xf32, #tpu.memory_space<vmem>>) attributes {dimension_semantics = [#tpu.dimension_semantics<parallel>, #tpu.dimension_semantics<parallel>], iteration_bounds = array<i64: 1, 1>, scalar_prefetch = 0 : i64, scratch_operands = 0 : i64, tpu.core_type = #tpu.core_type<tc>, window_params = [{transform_indices = @transform_0, window_bounds = array<i64: 2, 24>}, {transform_indices = @transform_1, window_bounds = array<i64: 2, 24>}]} {
    %c0 = arith.constant 0 : index
    %c0_0 = arith.constant 0 : index
    %0 = vector.load %arg2[%c0, %c0_0] : memref<2x24xf32, #tpu.memory_space<vmem>>, vector<2x24xf32>
    %cst = arith.constant 8.33333301 : f32
    %1 = vector.broadcast %cst : f32 to vector<2x24xf32>
    %2 = arith.mulf %0, %1 : vector<2x24xf32>
    %c0_1 = arith.constant 0 : index
    %c0_2 = arith.constant 0 : index
    %3 = vector.load %arg3[%c0_1, %c0_2] : memref<2x24xf32, #tpu.memory_space<vmem>>, vector<2x24xf32>
    tpu.vector_store %arg3[%c0_1, %c0_2], %2 {strides = array<i32>} : memref<2x24xf32, #tpu.memory_space<vmem>>, vector<2x24xf32>,
    return
  }
  func.func @transform_0(%arg0: i32, %arg1: i32) -> (i32, i32) {
    %c0_i32 = arith.constant 0 : i32
    return %arg0, %arg1 : i32, i32
  }
  func.func @transform_1(%arg0: i32, %arg1: i32) -> (i32, i32) {
    %c0_i32 = arith.constant 0 : i32
    return %arg0, %arg1 : i32, i32
  }
}

</mosaic_0001>

<bundles_post_ra>
// kernel: tpu_custom_call.1
= control target key start
LH: loop header
LB: loop body
LE: loop exit
PB: predicated region body
PF: predicated region fallthrough
CT: control target
= control target key end

     0   :  { %6 = vsyncpa [#allocation3], 0  ;;  %s104_s0 = inlined_call_operand.hbm [shape: f32[2,24], index: 0, kind: input, shape index: {}]   ;;  %s105_s1 = inlined_call_operand.hbm [shape: f32[2,24], index: 1, kind: output, shape index: {}]  }
   0x1   :  { %7 = vsyncpa [#allocation4], 0  ;;  %s86_s6 = smov [#allocation2]  }
   0x2   :  { %s14_s7 = sshll.u32 %s86_s6, 4  ;;  %s15_s7 = int_to_ptr.vmem [resolvable:$true] %s14_s7 }
   0x3   :  { %s50_s8 = scalar_lea.vmem %s15_s7, 32  ;;  %p55_p1 = scmp.lt.s32.totalorder %s15_s7, %s15_s7 }
   0x4   :  { %p51_p0 = scmp.ne.s32.totalorder %s15_s7, %s50_s8  ;;  %p56_p2 = scmp.lt.s32.totalorder %s50_s8, %s50_s8 }
   0x6   :  { %p57_p3 = por %p56_p2, %p55_p1 }
   0x8   :  { %p58_p4 = pnand %p57_p3, %p51_p0 }
   0xa   :  { %61 = shalt.err (!%p58_p4)
}
   0xb   :  { %17 = dma.hbm_to_vmem [thread:$0]  %s104_s0, 32, %s15_s7, [#allocation3]  }
   0xc   :  { %82 = dma.done.wait [#allocation3], 32  }
   0xd   :  { %83 = vsyncadd [#allocation3], 4294967264  ;;  %s87_s11 = smov [#allocation5]   ;;  %v21_v0 = vld [vmem:[#allocation2] sm:$0x3]  ;;  %vm23_vm0 = vcmask 189440  }
   0xe   :  { %s31_s12 = sshll.u32 %s87_s11, 4  ;;  %v22_v1 = vmul.f32 8.333333, %v21_v0  ;;  %s32_s12 = int_to_ptr.vmem [resolvable:$true] %s31_s12 }
   0xf   :  { %s62_s13 = scalar_lea.vmem %s32_s12, 32  ;;  %p67_p6 = scmp.lt.s32.totalorder %s32_s12, %s32_s12 }
  0x10   :  { %24 = vst.msk [vmem:[#allocation5] sm:$0x3] %vm23_vm0, %v22_v1  ;;  %p63_p5 = scmp.ne.s32.totalorder %s32_s12, %s62_s13  ;;  %p68_p7 = scmp.lt.s32.totalorder %s62_s13, %s62_s13 }
  0x12   :  { %p69_p8 = por %p68_p7, %p67_p6 }
  0x14   :  { %p70_p9 = pnand %p69_p8, %p63_p5 }
  0x16   :  { %73 = shalt.err (!%p70_p9)
}
  0x17   :  { %34 = dma.vmem_to_hbm [thread:$0]  %s32_s12, 32, %s105_s1, [#allocation4]  }
  0x18   :  { %84 = dma.done.wait [#allocation4], 32  }
  0x19   :  { %85 = vsyncadd [#allocation4], 4294967264 }
  0x1a   :  { %38 = vsyncpa [#allocation3], 1 }
  0x1b   :  { %39 = vsyncpa [#allocation4], 1 }

</bundles_post_ra>
